<compile_context>
chip_gen: v5e
topology: v5e:2x2
jax: 0.10.0
libtpu: 0.0.40
codegen_flags: <defaults>
</compile_context>

<pallas_src>
import types

import jax
import jax.numpy as jnp
from jax.experimental import pallas as pl
from jax.experimental.pallas import tpu as pltpu

_LANES = 128
_MIB = 1024 * 1024
_TARGET_BLOCK_BYTES = 4 * _MIB          # aim for >= 2-4 MiB per probability block


def _round_up(x, m):
    return ((x + m - 1) // m) * m


def _sublane_pack(dtype):
    # native sublane packing: 8 rows for 4-byte, 16 for 2-byte, 32 for 1-byte dtypes
    return max(8, 32 // jnp.dtype(dtype).itemsize)


def _vmem_capacity_bytes():
    try:
        return int(pltpu.get_tpu_info().vmem_capacity_bytes)
    except Exception:
        return 64 * _MIB                 # conservative default: v7x has 64 MiB per TC


def _vmem_budgets():
    cap = _vmem_capacity_bytes()
    limit_cap = (cap * 3) // 4           # never request more than 75% of physical VMEM
    block_budget = max(8 * _MIB, limit_cap - 8 * _MIB)   # leave Mosaic scratch headroom
    return block_budget, limit_cap


# ---------------------------------------------------------------------------
# Packed (lane-dense) path: C < 128, 128 % C == 0, N % (128 // C) == 0.
# probs reshaped to (N * C // 128, 128); each 128-lane row holds spr = 128//C samples.
# ---------------------------------------------------------------------------
def _plan_packed(n_packed, itemsize, pack, block_budget):
    # VMEM bytes per packed row (lane dim always 128):
    #   probs: 2 (double buffer) + ~1 (select temp)     -> 3 * itemsize * 128
    #   lane-iota int32 temp                            -> 4 * 128
    #   targets int32 (lane-padded to 128), 2 buffers   -> 8 * 128
    per_row = _LANES * (3 * itemsize + 4 + 8)
    rows_budget = max(pack, block_budget // per_row)
    rows_target = max(pack, _TARGET_BLOCK_BYTES // (_LANES * itemsize))
    rows = min(rows_target, rows_budget)
    if rows >= n_packed:
        return n_packed, 1               # single block == full array dims (always legal)
    rows = max(pack, (rows // pack) * pack)
    return rows, pl.cdiv(n_packed, rows)


def _make_packed_kernel(n_packed, tile_rows, samples_per_row):
    def kernel(probs_ref, tgt_ref, out_ref):
        i = pl.program_id(0)

        probs = probs_ref[...]                          # (tile_rows, 128), native dtype
        tgt = tgt_ref[...]                              # (tile_rows, spr) int32 in-row lane idx

        lane = jax.lax.broadcasted_iota(jnp.int32, probs.shape, 1)
        row = jax.lax.broadcasted_iota(jnp.int32, (tile_rows, 1), 0) + i * tile_rows
        valid = row < n_packed                          # mask rows of a partial last tile

        zero = jnp.zeros_like(probs)
        acc = jnp.zeros((tile_rows, 1), jnp.float32)
        for s in range(samples_per_row):                # static unroll, spr = 128 // C
            t = tgt[:, s:s + 1]                                          # (tile_rows, 1)
            picked = jnp.sum(jnp.where(lane == t, probs, zero),
                             axis=-1, keepdims=True)                     # exact: 1 nonzero
            picked = picked.astype(jnp.float32)         # cast AFTER gather, BEFORE eps/log
            picked = jnp.where(valid, picked, 1.0)      # keep log() defined on padding rows
            acc = acc + jnp.log(picked + 1e-8)

        partial = jnp.sum(jnp.where(valid, acc, 0.0))

        # lane-dense (8,128) partial block: value at [0,0], zeros elsewhere
        sub = jax.lax.broadcasted_iota(jnp.int32, (8, _LANES), 0)
        ln = jax.lax.broadcasted_iota(jnp.int32, (8, _LANES), 1)
        out_ref[0] = jnp.where((sub == 0) & (ln == 0), partial, 0.0)

    return kernel


# ---------------------------------------------------------------------------
# General path: batch tiling + optional class-axis reduction grid (vocab-scale C).
# ---------------------------------------------------------------------------
def _plan_general(n, c, itemsize, pack, block_budget):
    cp = _round_up(c, _LANES)
    per_cell = 3 * itemsize + 4                       # probs (2 buf + temp) + class iota int32
    per_row_extra = _LANES * (2 * 4 + 4)              # int32 targets (2 buf) + f32 acc scratch

    rows_full_c = block_budget // (cp * per_cell + per_row_extra)
    if rows_full_c >= pack:
        # a full-C block still allows a tall row tile -> no class split
        tile_c, num_c = c, 1
        tile_n = min(rows_full_c, max(pack, _TARGET_BLOCK_BYTES // (cp * itemsize)))
    else:
        # vocab-scale class count: add a reduction grid axis over classes
        tile_n = 8 * pack
        tile_c = (block_budget - tile_n * per_row_extra) // (tile_n * per_cell)
        tile_c = max(_LANES, (tile_c // _LANES) * _LANES)
        tile_c = min(tile_c,
                     max(_LANES, ((_TARGET_BLOCK_BYTES // (tile_n * itemsize)) // _LANES) * _LANES))
        if tile_c >= cp:
            tile_c, num_c = c, 1
        else:
            num_c = pl.cdiv(c, tile_c)

    if tile_n >= n:
        tile_n, num_n = n, 1
    else:
        tile_n = max(pack, (tile_n // pack) * pack)
        num_n = pl.cdiv(n, tile_n)
    return tile_n, num_n, tile_c, num_c


def _make_general_kernel(n_total, tile_n, tile_c):
    def kernel(probs_ref, tgt_ref, out_ref, acc_ref):
        i = pl.program_id(0)
        j = pl.program_id(1)

        @pl.when(j == 0)
        def _init():
            acc_ref[...] = jnp.zeros_like(acc_ref)

        probs = probs_ref[...]                          # (tile_n, tile_c), native dtype
        tgt = tgt_ref[...]                              # (tile_n, 1) int32
        cls = jax.lax.broadcasted_iota(jnp.int32, probs.shape, 1) + j * tile_c
        hit = cls == tgt                                # padded/garbage class cols never match
        picked = jnp.sum(jnp.where(hit, probs, jnp.zeros_like(probs)),
                         axis=-1, keepdims=True)
        acc_ref[...] += picked.astype(jnp.float32)      # f32 accumulate across class tiles

        @pl.when(j == pl.num_programs(1) - 1)
        def _finish():
            row = jax.lax.broadcasted_iota(jnp.int32, (tile_n, 1), 0) + i * tile_n
            valid = row < n_total
            picked_f = jnp.where(valid, acc_ref[...], 1.0)
            logp = jnp.log(picked_f + 1e-8)             # log AFTER the class reduction
            partial = jnp.sum(jnp.where(valid, logp, 0.0))
            sub = jax.lax.broadcasted_iota(jnp.int32, (8, _LANES), 0)
            ln = jax.lax.broadcasted_iota(jnp.int32, (8, _LANES), 1)
            out_ref[0] = jnp.where((sub == 0) & (ln == 0), partial, 0.0)

    return kernel


# ---------------------------------------------------------------------------
# Wrapper
# ---------------------------------------------------------------------------
def nll_loss_pallas(output, target, *, row_tile=None, class_tile=None):
    """Mean negative-log-likelihood of log(output + 1e-8) w.r.t. integer targets."""
    n, c = output.shape
    itemsize = jnp.dtype(output.dtype).itemsize
    pack = _sublane_pack(output.dtype)
    block_budget, limit_cap = _vmem_budgets()

    spr = _LANES // c if (0 < c < _LANES and _LANES % c == 0) else 0
    use_packed = (spr > 0) and (n % spr == 0) and (class_tile is None)

    if use_packed:
        n_packed = n // spr
        probs = output.reshape(n_packed, _LANES)        # free row-major reshape
        # per-sample lane index inside its packed row: slot*C + target
        tgt_local = (target.astype(jnp.int32) +
                     (jnp.arange(n, dtype=jnp.int32) % spr) * c).reshape(n_packed, spr)

        tile_rows, num_tiles = _plan_packed(n_packed, itemsize, pack, block_budget)
        if row_tile is not None:
            tile_rows = min(row_tile, n_packed)
            num_tiles = pl.cdiv(n_packed, tile_rows)

        footprint = tile_rows * _LANES * (3 * itemsize + 4 + 8) + 2 * 8 * _LANES * 4
        vmem_limit = int(min(max(footprint + 8 * _MIB, 16 * _MIB), limit_cap))

        partials = pl.pallas_call(
            _make_packed_kernel(n_packed, tile_rows, spr),
            out_shape=jax.ShapeDtypeStruct((num_tiles, 8, _LANES), jnp.float32),
            grid=(num_tiles,),
            in_specs=[
                pl.BlockSpec((tile_rows, _LANES), lambda i: (i, 0)),   # lane-dense probs
                pl.BlockSpec((tile_rows, spr), lambda i: (i, 0)),      # packed targets
            ],
            out_specs=pl.BlockSpec((1, 8, _LANES), lambda i: (i, 0, 0)),
            compiler_params=pltpu.CompilerParams(
                # TODO(synk): on v7x verify both TensorCores pick up this axis; switch to
                # pltpu.CORE_PARALLEL if the trace shows it is not being split.
                dimension_semantics=("parallel",),
                vmem_limit_bytes=vmem_limit,
            ),
        )(probs, tgt_local)
    else:
        tgt2d = target.astype(jnp.int32).reshape(n, 1)
        tile_n, num_n, tile_c, num_c = _plan_general(n, c, itemsize, pack, block_budget)
        if row_tile is not None:
            tile_n = min(row_tile, n)
            num_n = pl.cdiv(n, tile_n)
        if class_tile is not None and class_tile < c:
            tile_c = class_tile                         # must be a multiple of 128
            num_c = pl.cdiv(c, tile_c)

        cp_tile = tile_c if num_c == 1 else _round_up(tile_c, _LANES)
        footprint = (tile_n * (_round_up(cp_tile, 1) * (3 * itemsize + 4)
                               + _LANES * (2 * 4 + 4))
                     + 2 * 8 * _LANES * 4)
        vmem_limit = int(min(max(footprint + 8 * _MIB, 16 * _MIB), limit_cap))

        partials = pl.pallas_call(
            _make_general_kernel(n, tile_n, tile_c),
            out_shape=jax.ShapeDtypeStruct((num_n, 8, _LANES), jnp.float32),
            grid=(num_n, num_c),                        # reduction (class) axis last
            in_specs=[
                pl.BlockSpec((tile_n, tile_c), lambda i, j: (i, j)),
                pl.BlockSpec((tile_n, 1), lambda i, j: (i, 0)),
            ],
            out_specs=pl.BlockSpec((1, 8, _LANES), lambda i, j: (i, 0, 0)),
            scratch_shapes=[pltpu.VMEM((tile_n, 1), jnp.float32)],
            compiler_params=pltpu.CompilerParams(
                dimension_semantics=("parallel", "arbitrary"),
                vmem_limit_bytes=vmem_limit,
            ),
        )(output, tgt2d)

    # tiny epilogue: sum per-tile partials, normalize by the GLOBAL batch size
    return -jnp.sum(partials) / jnp.float32(n)


class ClassificationLoss:
    """JAX/Pallas port of BNN ClassificationLoss."""

    def __init__(self, args, scaling):
        self.args = args
        self.scaling = scaling

    def __call__(self, output, target, kl, gamma, n_batches, n_points):
        nll = nll_loss_pallas(output, target)
        if self.scaling == "whole":
            ce = n_points * nll * self.args.loss_multiplier
            kl = kl / n_batches
        elif self.scaling == "batch":
            ce = nll
            kl = kl / (target.shape[0] * n_batches)
        else:
            raise NotImplementedError("Other scaling not implemented!")
        loss = ce + gamma + kl
        return (loss, ce, kl)


if __name__ == "__main__":
    key = jax.random.PRNGKey(0)
    k1, k2, k3, k4, k5, k6, k7, k8 = jax.random.split(key, 8)
    args = types.SimpleNamespace(loss_multiplier=1.0)

    # --- case 1: packed lane-dense path, single block (C=16 -> 8 samples per row) ---
    N, C = 8, 16
    output = jax.nn.softmax(jax.random.normal(k1, (N, C), dtype=jnp.float32), axis=-1)
    target = jax.random.randint(k2, (N,), 0, C, dtype=jnp.int32)
    kl = jnp.float32(3.7)
    gamma = jnp.float32(0.25)
    n_batches = 10
    n_points = 1000

    loss_b, ce_b, kl_b = ClassificationLoss(args, "batch")(output, target, kl, gamma,
                                                           n_batches, n_points)
    loss_w, ce_w, kl_w = ClassificationLoss(args, "whole")(output, target, kl, gamma,
                                                           n_batches, n_points)
    jax.block_until_ready((loss_b, ce_b, kl_b, loss_w, ce_w, kl_w))

    nll_ref = -jnp.mean(jnp.log(output + 1e-8)[jnp.arange(N), target])
    assert jnp.allclose(ce_b, nll_ref, rtol=1e-5, atol=1e-5)
    assert jnp.allclose(ce_w, n_points * nll_ref * args.loss_multiplier, rtol=1e-4, atol=1e-4)
    assert jnp.allclose(loss_b, ce_b + gamma + kl / (N * n_batches), rtol=1e-5, atol=1e-5)
    assert jnp.allclose(loss_w, ce_w + gamma + kl / n_batches, rtol=1e-4, atol=1e-4)

    # --- case 2: general path (N not divisible by samples-per-row), partial last row tile ---
    N2, C2 = 20, 16
    out2 = jax.nn.softmax(jax.random.normal(k3, (N2, C2), dtype=jnp.float32), axis=-1)
    tgt2 = jax.random.randint(k4, (N2,), 0, C2, dtype=jnp.int32)
    nll2 = nll_loss_pallas(out2, tgt2, row_tile=8)
    jax.block_until_ready(nll2)
    ref2 = -jnp.mean(jnp.log(out2 + 1e-8)[jnp.arange(N2), tgt2])
    assert jnp.allclose(nll2, ref2, rtol=1e-5, atol=1e-5)

    # --- case 3: packed path, bf16 input, multiple row tiles with a partial last tile ---
    N3, C3 = 640, 16
    out3 = jax.nn.softmax(jax.random.normal(k5, (N3, C3), dtype=jnp.float32),
                          axis=-1).astype(jnp.bfloat16)
    tgt3 = jax.random.randint(k6, (N3,), 0, C3, dtype=jnp.int32)
    nll3 = nll_loss_pallas(out3, tgt3, row_tile=32)
    jax.block_until_ready(nll3)
    ref3 = -jnp.mean(jnp.log(out3.astype(jnp.float32) + 1e-8)[jnp.arange(N3), tgt3])
    assert jnp.allclose(nll3, ref3, rtol=2e-5, atol=2e-5)

    # --- case 4: general path with a class-axis reduction grid (vocab-style C split) ---
    N4, C4 = 16, 300
    out4 = jax.nn.softmax(jax.random.normal(k7, (N4, C4), dtype=jnp.float32), axis=-1)
    tgt4 = jax.random.randint(k8, (N4,), 0, C4, dtype=jnp.int32)
    nll4 = nll_loss_pallas(out4, tgt4, row_tile=8, class_tile=128)
    jax.block_until_ready(nll4)
    ref4 = -jnp.mean(jnp.log(out4 + 1e-8)[jnp.arange(N4), tgt4])
    assert jnp.allclose(nll4, ref4, rtol=1e-5, atol=1e-5)

    print("KERNEL_OK")
</pallas_src>

<mosaic_0001>
module attributes {stable_mosaic.version = 11 : i64} {
  func.func @kernel(%arg0: i32, %arg1: memref<1x128xf32, #tpu.memory_space<vmem>>, %arg2: memref<1x8xi32, #tpu.memory_space<vmem>>, %arg3: memref<1x8x128xf32, #tpu.memory_space<vmem>>) attributes {dimension_semantics = [#tpu.dimension_semantics<parallel>], iteration_bounds = array<i64: 1>, scalar_prefetch = 0 : i64, scratch_operands = 0 : i64, tpu.core_type = #tpu.core_type<tc>, window_params = [{transform_indices = @transform_0, window_bounds = array<i64: 1, 128>}, {transform_indices = @transform_1, window_bounds = array<i64: 1, 8>}, {transform_indices = @transform_2, window_bounds = array<i64: 1, 8, 128>}]} {
    %c0 = arith.constant 0 : index
    %c0_0 = arith.constant 0 : index
    %0 = vector.load %arg1[%c0, %c0_0] : memref<1x128xf32, #tpu.memory_space<vmem>>, vector<1x128xf32>
    %c0_1 = arith.constant 0 : index
    %c0_2 = arith.constant 0 : index
    %1 = vector.load %arg2[%c0_1, %c0_2] : memref<1x8xi32, #tpu.memory_space<vmem>>, vector<1x8xi32>
    %2 = tpu.iota {dimensions = array<i32: 1>} : vector<1x128xi32>
    %3 = tpu.iota {dimensions = array<i32: 0>} : vector<1x1xi32>
    %c1_i32 = arith.constant 1 : i32
    %4 = arith.muli %arg0, %c1_i32 : i32
    %5 = vector.broadcast %4 : i32 to vector<1x1xi32>
    %6 = arith.addi %3, %5 : vector<1x1xi32>
    %c1_i32_3 = arith.constant 1 : i32
    %7 = vector.broadcast %c1_i32_3 : i32 to vector<1x1xi32>
    %8 = arith.cmpi slt, %6, %7 : vector<1x1xi32>
    %cst = arith.constant 0.000000e+00 : f32
    %9 = vector.broadcast %cst : f32 to vector<1x128xf32>
    %cst_4 = arith.constant 0.000000e+00 : f32
    %10 = vector.broadcast %cst_4 : f32 to vector<1x1xf32>
    %11 = vector.extract_strided_slice %1 {offsets = [0, 0], sizes = [1, 1], strides = [1, 1]} : vector<1x8xi32> to vector<1x1xi32>
    %12 = vector.broadcast %11 : vector<1x1xi32> to vector<1x128xi32>
    %13 = arith.cmpi eq, %2, %12 : vector<1x128xi32>
    %14 = arith.select %13, %0, %9 : vector<1x128xi1>, vector<1x128xf32>
    %cst_5 = arith.constant dense<0.000000e+00> : vector<1xf32>
    %15 = vector.multi_reduction <add>, %14, %cst_5 [1] : vector<1x128xf32> to vector<1xf32>
    %16 = vector.shape_cast %15 : vector<1xf32> to vector<1x1xf32>
    %cst_6 = arith.constant 1.000000e+00 : f32
    %17 = vector.broadcast %cst_6 : f32 to vector<1x1xf32>
    %18 = arith.select %8, %16, %17 : vector<1x1xi1>, vector<1x1xf32>
    %cst_7 = arith.constant 9.99999993E-9 : f32
    %19 = vector.broadcast %cst_7 : f32 to vector<1x1xf32>
    %20 = arith.addf %18, %19 : vector<1x1xf32>
    %21 = math.log %20 : vector<1x1xf32>
    %22 = arith.addf %10, %21 : vector<1x1xf32>
    %23 = vector.extract_strided_slice %1 {offsets = [0, 1], sizes = [1, 1], strides = [1, 1]} : vector<1x8xi32> to vector<1x1xi32>
    %24 = vector.broadcast %23 : vector<1x1xi32> to vector<1x128xi32>
    %25 = arith.cmpi eq, %2, %24 : vector<1x128xi32>
    %26 = arith.select %25, %0, %9 : vector<1x128xi1>, vector<1x128xf32>
    %cst_8 = arith.constant dense<0.000000e+00> : vector<1xf32>
    %27 = vector.multi_reduction <add>, %26, %cst_8 [1] : vector<1x128xf32> to vector<1xf32>
    %28 = vector.shape_cast %27 : vector<1xf32> to vector<1x1xf32>
    %cst_9 = arith.constant 1.000000e+00 : f32
    %29 = vector.broadcast %cst_9 : f32 to vector<1x1xf32>
    %30 = arith.select %8, %28, %29 : vector<1x1xi1>, vector<1x1xf32>
    %cst_10 = arith.constant 9.99999993E-9 : f32
    %31 = vector.broadcast %cst_10 : f32 to vector<1x1xf32>
    %32 = arith.addf %30, %31 : vector<1x1xf32>
    %33 = math.log %32 : vector<1x1xf32>
    %34 = arith.addf %22, %33 : vector<1x1xf32>
    %35 = vector.extract_strided_slice %1 {offsets = [0, 2], sizes = [1, 1], strides = [1, 1]} : vector<1x8xi32> to vector<1x1xi32>
    %36 = vector.broadcast %35 : vector<1x1xi32> to vector<1x128xi32>
    %37 = arith.cmpi eq, %2, %36 : vector<1x128xi32>
    %38 = arith.select %37, %0, %9 : vector<1x128xi1>, vector<1x128xf32>
    %cst_11 = arith.constant dense<0.000000e+00> : vector<1xf32>
    %39 = vector.multi_reduction <add>, %38, %cst_11 [1] : vector<1x128xf32> to vector<1xf32>
    %40 = vector.shape_cast %39 : vector<1xf32> to vector<1x1xf32>
    %cst_12 = arith.constant 1.000000e+00 : f32
    %41 = vector.broadcast %cst_12 : f32 to vector<1x1xf32>
    %42 = arith.select %8, %40, %41 : vector<1x1xi1>, vector<1x1xf32>
    %cst_13 = arith.constant 9.99999993E-9 : f32
    %43 = vector.broadcast %cst_13 : f32 to vector<1x1xf32>
    %44 = arith.addf %42, %43 : vector<1x1xf32>
    %45 = math.log %44 : vector<1x1xf32>
    %46 = arith.addf %34, %45 : vector<1x1xf32>
    %47 = vector.extract_strided_slice %1 {offsets = [0, 3], sizes = [1, 1], strides = [1, 1]} : vector<1x8xi32> to vector<1x1xi32>
    %48 = vector.broadcast %47 : vector<1x1xi32> to vector<1x128xi32>
    %49 = arith.cmpi eq, %2, %48 : vector<1x128xi32>
    %50 = arith.select %49, %0, %9 : vector<1x128xi1>, vector<1x128xf32>
    %cst_14 = arith.constant dense<0.000000e+00> : vector<1xf32>
    %51 = vector.multi_reduction <add>, %50, %cst_14 [1] : vector<1x128xf32> to vector<1xf32>
    %52 = vector.shape_cast %51 : vector<1xf32> to vector<1x1xf32>
    %cst_15 = arith.constant 1.000000e+00 : f32
    %53 = vector.broadcast %cst_15 : f32 to vector<1x1xf32>
    %54 = arith.select %8, %52, %53 : vector<1x1xi1>, vector<1x1xf32>
    %cst_16 = arith.constant 9.99999993E-9 : f32
    %55 = vector.broadcast %cst_16 : f32 to vector<1x1xf32>
    %56 = arith.addf %54, %55 : vector<1x1xf32>
    %57 = math.log %56 : vector<1x1xf32>
    %58 = arith.addf %46, %57 : vector<1x1xf32>
    %59 = vector.extract_strided_slice %1 {offsets = [0, 4], sizes = [1, 1], strides = [1, 1]} : vector<1x8xi32> to vector<1x1xi32>
    %60 = vector.broadcast %59 : vector<1x1xi32> to vector<1x128xi32>
    %61 = arith.cmpi eq, %2, %60 : vector<1x128xi32>
    %62 = arith.select %61, %0, %9 : vector<1x128xi1>, vector<1x128xf32>
    %cst_17 = arith.constant dense<0.000000e+00> : vector<1xf32>
    %63 = vector.multi_reduction <add>, %62, %cst_17 [1] : vector<1x128xf32> to vector<1xf32>
    %64 = vector.shape_cast %63 : vector<1xf32> to vector<1x1xf32>
    %cst_18 = arith.constant 1.000000e+00 : f32
    %65 = vector.broadcast %cst_18 : f32 to vector<1x1xf32>
    %66 = arith.select %8, %64, %65 : vector<1x1xi1>, vector<1x1xf32>
    %cst_19 = arith.constant 9.99999993E-9 : f32
    %67 = vector.broadcast %cst_19 : f32 to vector<1x1xf32>
    %68 = arith.addf %66, %67 : vector<1x1xf32>
    %69 = math.log %68 : vector<1x1xf32>
    %70 = arith.addf %58, %69 : vector<1x1xf32>
    %71 = vector.extract_strided_slice %1 {offsets = [0, 5], sizes = [1, 1], strides = [1, 1]} : vector<1x8xi32> to vector<1x1xi32>
    %72 = vector.broadcast %71 : vector<1x1xi32> to vector<1x128xi32>
    %73 = arith.cmpi eq, %2, %72 : vector<1x128xi32>
    %74 = arith.select %73, %0, %9 : vector<1x128xi1>, vector<1x128xf32>
    %cst_20 = arith.constant dense<0.000000e+00> : vector<1xf32>
    %75 = vector.multi_reduction <add>, %74, %cst_20 [1] : vector<1x128xf32> to vector<1xf32>
    %76 = vector.shape_cast %75 : vector<1xf32> to vector<1x1xf32>
    %cst_21 = arith.constant 1.000000e+00 : f32
    %77 = vector.broadcast %cst_21 : f32 to vector<1x1xf32>
    %78 = arith.select %8, %76, %77 : vector<1x1xi1>, vector<1x1xf32>
    %cst_22 = arith.constant 9.99999993E-9 : f32
    %79 = vector.broadcast %cst_22 : f32 to vector<1x1xf32>
    %80 = arith.addf %78, %79 : vector<1x1xf32>
    %81 = math.log %80 : vector<1x1xf32>
    %82 = arith.addf %70, %81 : vector<1x1xf32>
    %83 = vector.extract_strided_slice %1 {offsets = [0, 6], sizes = [1, 1], strides = [1, 1]} : vector<1x8xi32> to vector<1x1xi32>
    %84 = vector.broadcast %83 : vector<1x1xi32> to vector<1x128xi32>
    %85 = arith.cmpi eq, %2, %84 : vector<1x128xi32>
    %86 = arith.select %85, %0, %9 : vector<1x128xi1>, vector<1x128xf32>
    %cst_23 = arith.constant dense<0.000000e+00> : vector<1xf32>
    %87 = vector.multi_reduction <add>, %86, %cst_23 [1] : vector<1x128xf32> to vector<1xf32>
    %88 = vector.shape_cast %87 : vector<1xf32> to vector<1x1xf32>
    %cst_24 = arith.constant 1.000000e+00 : f32
    %89 = vector.broadcast %cst_24 : f32 to vector<1x1xf32>
    %90 = arith.select %8, %88, %89 : vector<1x1xi1>, vector<1x1xf32>
    %cst_25 = arith.constant 9.99999993E-9 : f32
    %91 = vector.broadcast %cst_25 : f32 to vector<1x1xf32>
    %92 = arith.addf %90, %91 : vector<1x1xf32>
    %93 = math.log %92 : vector<1x1xf32>
    %94 = arith.addf %82, %93 : vector<1x1xf32>
    %95 = vector.extract_strided_slice %1 {offsets = [0, 7], sizes = [1, 1], strides = [1, 1]} : vector<1x8xi32> to vector<1x1xi32>
    %96 = vector.broadcast %95 : vector<1x1xi32> to vector<1x128xi32>
    %97 = arith.cmpi eq, %2, %96 : vector<1x128xi32>
    %98 = arith.select %97, %0, %9 : vector<1x128xi1>, vector<1x128xf32>
    %cst_26 = arith.constant dense<0.000000e+00> : vector<1xf32>
    %99 = vector.multi_reduction <add>, %98, %cst_26 [1] : vector<1x128xf32> to vector<1xf32>
    %100 = vector.shape_cast %99 : vector<1xf32> to vector<1x1xf32>
    %cst_27 = arith.constant 1.000000e+00 : f32
    %101 = vector.broadcast %cst_27 : f32 to vector<1x1xf32>
    %102 = arith.select %8, %100, %101 : vector<1x1xi1>, vector<1x1xf32>
    %cst_28 = arith.constant 9.99999993E-9 : f32
    %103 = vector.broadcast %cst_28 : f32 to vector<1x1xf32>
    %104 = arith.addf %102, %103 : vector<1x1xf32>
    %105 = math.log %104 : vector<1x1xf32>
    %106 = arith.addf %94, %105 : vector<1x1xf32>
    %cst_29 = arith.constant 0.000000e+00 : f32
    %107 = vector.broadcast %cst_29 : f32 to vector<1x1xf32>
    %108 = arith.select %8, %106, %107 : vector<1x1xi1>, vector<1x1xf32>
    %109 = vector.shape_cast %108 : vector<1x1xf32> to vector<1x1x1xf32>
    %cst_30 = arith.constant dense<0.000000e+00> : vector<1xf32>
    %110 = vector.multi_reduction <add>, %109, %cst_30 [1, 2] : vector<1x1x1xf32> to vector<1xf32>
    %111 = vector.shape_cast %110 : vector<1xf32> to vector<1x1x1xf32>
    %112 = vector.extract %111[0, 0, 0] : f32 from vector<1x1x1xf32>
    %113 = tpu.iota {dimensions = array<i32: 0>} : vector<8x128xi32>
    %114 = tpu.iota {dimensions = array<i32: 1>} : vector<8x128xi32>
    %c0_i32 = arith.constant 0 : i32
    %115 = vector.broadcast %c0_i32 : i32 to vector<8x128xi32>
    %116 = arith.cmpi eq, %113, %115 : vector<8x128xi32>
    %c0_i32_31 = arith.constant 0 : i32
    %117 = vector.broadcast %c0_i32_31 : i32 to vector<8x128xi32>
    %118 = arith.cmpi eq, %114, %117 : vector<8x128xi32>
    %119 = arith.andi %116, %118 : vector<8x128xi1>
    %cst_32 = arith.constant 0.000000e+00 : f32
    %120 = vector.broadcast %112 : f32 to vector<8x128xf32>
    %121 = vector.broadcast %cst_32 : f32 to vector<8x128xf32>
    %122 = arith.select %119, %120, %121 : vector<8x128xi1>, vector<8x128xf32>
    %c0_33 = arith.constant 0 : index
    %c0_34 = arith.constant 0 : index
    %c0_35 = arith.constant 0 : index
    %123 = vector.load %arg3[%c0_33, %c0_34, %c0_35] : memref<1x8x128xf32, #tpu.memory_space<vmem>>, vector<1x8x128xf32>
    %124 = vector.shape_cast %123 : vector<1x8x128xf32> to vector<8x128xf32>
    %125 = vector.shape_cast %122 : vector<8x128xf32> to vector<1x8x128xf32>
    tpu.vector_store %arg3[%c0_33, %c0_34, %c0_35], %125 {strides = array<i32>} : memref<1x8x128xf32, #tpu.memory_space<vmem>>, vector<1x8x128xf32>,
    return
  }
  func.func @transform_0(%arg0: i32) -> (i32, i32) {
    %c0_i32 = arith.constant 0 : i32
    %c0_i32_0 = arith.constant 0 : i32
    return %arg0, %c0_i32 : i32, i32
  }
  func.func @transform_1(%arg0: i32) -> (i32, i32) {
    %c0_i32 = arith.constant 0 : i32
    %c0_i32_0 = arith.constant 0 : i32
    return %arg0, %c0_i32 : i32, i32
  }
  func.func @transform_2(%arg0: i32) -> (i32, i32, i32) {
    %c0_i32 = arith.constant 0 : i32
    %c0_i32_0 = arith.constant 0 : i32
    %c0_i32_1 = arith.constant 0 : i32
    return %arg0, %c0_i32, %c0_i32_0 : i32, i32, i32
  }
}

</mosaic_0001>

<bundles_post_ra>
// kernel: tpu_custom_call.1
= control target key start
LH: loop header
LB: loop body
LE: loop exit
PB: predicated region body
PF: predicated region fallthrough
CT: control target
= control target key end

     0   :  { %7 = vsyncpa [#allocation3], 0  ;;  %s381_s0 = inlined_call_operand.hbm [shape: f32[1,128], index: 0, kind: input, shape index: {}]   ;;  %s382_s1 = inlined_call_operand.hbm [shape: s32[1,8], index: 1, kind: input, shape index: {}]   ;;  %s383_s2 = inlined_call_operand.hbm [shape: f32[1,8,128], index: 2, kind: output, shape index: {}]  }
   0x1   :  { %8 = vsyncpa [#allocation6], 0 }
   0x2   :  { %9 = vsyncpa [#allocation4], 0  ;;  %s15_s11 = sshll.u32 %s381_s0, 4  ;;  %s305_s12 = smov [#allocation2]   ;;  %s16_s11 = int_to_ptr.hbm [resolvable:$true] %s15_s11 }
   0x3   :  { %s17_s13 = sshll.u32 %s305_s12, 4  ;;  %s26_s16 = sshll.u32 %s382_s1, 4  ;;  %s18_s13 = int_to_ptr.vmem [resolvable:$true] %s17_s13  ;;  %s27_s16 = int_to_ptr.hbm [resolvable:$true] %s26_s16 }
   0x4   :  { %20 = dma.hbm_to_vmem [thread:$0]  %s16_s11, 16, %s18_s13, [#allocation3]  }
   0x5   :  { %s306_s17 = smov [#allocation5]  }
   0x6   :  { %s28_s18 = sshll.u32 %s306_s17, 4  ;;  %s29_s18 = int_to_ptr.vmem [resolvable:$true] %s28_s18 }
   0x7   :  { %31 = dma.hbm_to_vmem [thread:$0]  %s27_s16, 16, %s29_s18, [#allocation6]  }
   0x8   :  { %299 = dma.done.wait [#allocation3], 16  }
   0x9   :  { %300 = vsyncadd [#allocation3], 4294967280 }
   0xa   :  { %301 = dma.done.wait [#allocation6], 16  }
   0xb   :  { %302 = vsyncadd [#allocation6], 4294967280  ;;  %v307_v0 = vmov 1   ;;  %v308_v1 = vmov 0   ;;  %v309_v2 = vmov 2   ;;  %v310_v4 = vmov 7  }
   0xc   :  { %203 = vset.pattern.permute.xlu1 %v307_v0  ;;  %202 = vset.pattern.permute.xlu0 %v308_v1  ;;  %v41_v3 = vld [vmem:[#allocation5] sm:$0x1]  ;;  %v311_v5 = vmov 3   ;;  %v312_v6 = vmov 4   ;;  %v313_v7 = vmov 5   ;;  %v314_v8 = vmov 6  }
   0xd   :  { %204 = vset.pattern.permute.xlu2 %v309_v2  ;;  %65 = vperm.xlu1 %203, %v41_v3   ;;  %v42_v9 = vlaneseq  ;;  %v40_v13 = vld [vmem:[#allocation2] sm:$0x1]  ;;  %vm55_vm0 = vcmask 1040384   ;;  %s315_s0 = smov [#allocation7]   ;;  %s178_s21 = sshll.u32 %s383_s2, 4  ;;  %s179_s21 = int_to_ptr.hbm [resolvable:$true] %s178_s21 }
   0xe   :  { %50 = vperm.xlu0 %202, %v41_v3   ;;  %79 = vperm.xlu2 %204, %v41_v3   ;;  %s176_s1 = sshll.u32 %s315_s0, 4  ;;  %s177_s1 = int_to_ptr.vmem [resolvable:$true] %s176_s1 }
   0xf   :  { %v337_v10 = vand.u32 127, %v42_v9  ;;  %v355_v44 = vshrl.u32 %v42_v9, 7 }
  0x11   :  { %vm48_vm9 = vcmp.lt.s32.totalorder %v355_v44, 1  ;;  %vm165_vm10 = vcmp.eq.s32.totalorder %v355_v44, 0  ;;  %vm166_vm11 = vcmp.eq.s32.totalorder %v337_v10, 0 }
  0x12   :  { %vm167_vm12 = vmand %vm165_vm10, %vm166_vm11 }
  0x16   :  { %210 = vset.pattern.permute.xlu0 %v310_v4  ;;  %205 = vset.pattern.permute.xlu2 %v311_v5 }
  0x17   :  { %93 = vperm.xlu2 %205, %v41_v3  }
  0x1f   :  { %206 = vset.pattern.permute.xlu2 %v312_v6 }
  0x20   :  { %107 = vperm.xlu2 %206, %v41_v3  }
  0x28   :  { %207 = vset.pattern.permute.xlu2 %v313_v7 }
  0x29   :  { %121 = vperm.xlu2 %207, %v41_v3  }
  0x31   :  { %208 = vset.pattern.permute.xlu2 %v314_v8 }
  0x32   :  { %135 = vperm.xlu2 %208, %v41_v3  }
  0x3a   :  { %209 = vset.pattern.permute.xlu2 %v310_v4 }
  0x3b   :  { %149 = vperm.xlu2 %209, %v41_v3  }
  0x68   :  { %v80_v11 = vpop.permute.xlu2 %79 }
  0x69   :  { %v81_v12 = vperm.slane %v80_v11, 0 }
  0x6b   :  { %vm82_vm1 = vcmp.eq.s32.totalorder %v337_v10, %v81_v12 }
  0x6c   :  { %v83_v14 = vsel %vm82_vm1, %v40_v13, 0.0 }
  0x6d   :  { %v84_v15 = vsel %vm55_vm0, %v83_v14, 0.0 }
  0x6e   :  { %85 = vadd.xlane.f32.xlu2 %v84_v15 }
  0x71   :  { %v94_v16 = vpop.permute.xlu2 %93 }
  0x72   :  { %v95_v22 = vperm.slane %v94_v16, 0 }
  0x74   :  { %vm96_vm5 = vcmp.eq.s32.totalorder %v337_v10, %v95_v22 }
  0x75   :  { %v97_v30 = vsel %vm96_vm5, %v40_v13, 0.0 }
  0x76   :  { %v98_v33 = vsel %vm55_vm0, %v97_v30, 0.0 }
  0x7a   :  { %v108_v17 = vpop.permute.xlu2 %107 }
  0x7b   :  { %v109_v23 = vperm.slane %v108_v17, 0 }
  0x7d   :  { %vm110_vm4 = vcmp.eq.s32.totalorder %v337_v10, %v109_v23 }
  0x7e   :  { %v111_v29 = vsel %vm110_vm4, %v40_v13, 0.0 }
  0x7f   :  { %v66_v18 = vpop.permute.xlu1 %65  ;;  %v112_v32 = vsel %vm55_vm0, %v111_v29, 0.0 }
  0x80   :  { %v51_v19 = vpop.permute.xlu0 %50  ;;  %v67_v20 = vperm.slane %v66_v18, 0 }
  0x81   :  { %v52_v21 = vperm.slane %v51_v19, 0 }
  0x82   :  { %vm68_vm2 = vcmp.eq.s32.totalorder %v337_v10, %v67_v20 }
  0x83   :  { %vm53_vm3 = vcmp.eq.s32.totalorder %v337_v10, %v52_v21  ;;  %v122_v24 = vpop.permute.xlu2 %121  ;;  %v69_v25 = vsel %vm68_vm2, %v40_v13, 0.0 }
  0x84   :  { %v54_v26 = vsel %vm53_vm3, %v40_v13, 0.0  ;;  %v70_v27 = vsel %vm55_vm0, %v69_v25, 0.0  ;;  %v123_v31 = vperm.slane %v122_v24, 0 }
  0x85   :  { %v56_v28 = vsel %vm55_vm0, %v54_v26, 0.0  ;;  %71 = vadd.xlane.f32.xlu1 %v70_v27 }
  0x86   :  { %57 = vadd.xlane.f32.xlu0 %v56_v28  ;;  %vm124_vm6 = vcmp.eq.s32.totalorder %v337_v10, %v123_v31 }
  0x87   :  { %v125_v37 = vsel %vm124_vm6, %v40_v13, 0.0 }
  0x88   :  { %v126_v39 = vsel %vm55_vm0, %v125_v37, 0.0 }
  0x8c   :  { %v136_v34 = vpop.permute.xlu2 %135 }
  0x8d   :  { %113 = vadd.xlane.f32.xlu1 %v112_v32  ;;  %v137_v35 = vperm.slane %v136_v34, 0 }
  0x8e   :  { %99 = vadd.xlane.f32.xlu0 %v98_v33 }
  0x8f   :  { %vm138_vm7 = vcmp.eq.s32.totalorder %v337_v10, %v137_v35 }
  0x90   :  { %v139_v36 = vsel %vm138_vm7, %v40_v13, 0.0 }
  0x91   :  { %v140_v38 = vsel %vm55_vm0, %v139_v36, 0.0 }
  0x95   :  { %141 = vadd.xlane.f32.xlu1 %v140_v38  ;;  %v150_v40 = vpop.permute.xlu2 %149 }
  0x96   :  { %127 = vadd.xlane.f32.xlu0 %v126_v39  ;;  %v151_v41 = vperm.slane %v150_v40, 0 }
  0x98   :  { %vm152_vm8 = vcmp.eq.s32.totalorder %v337_v10, %v151_v41 }
  0x99   :  { %v153_v42 = vsel %vm152_vm8, %v40_v13, 0.0 }
  0x9a   :  { %v154_v43 = vsel %vm55_vm0, %v153_v42, 0.0 }
  0x9e   :  { %155 = vadd.xlane.f32.xlu0 %v154_v43 }
  0xe1   :  { %v86_v49 = vpop.xlane.xlu2 %85 }
  0xe2   :  { %v87_v52 = vsel %vm48_vm9, %v86_v49, 1.0 }
  0xe3   :  { %v88_v53 = vadd.f32 1e-08, %v87_v52 }
  0xf8   :  { %v72_v45 = vpop.xlane.xlu1 %71 }
  0xf9   :  { %v58_v46 = vpop.xlane.xlu0 %57  ;;  %v73_v47 = vsel %vm48_vm9, %v72_v45, 1.0 }
  0xfa   :  { %v59_v48 = vsel %vm48_vm9, %v58_v46, 1.0  ;;  %v74_v50 = vadd.f32 1e-08, %v73_v47 }
  0xfb   :  { %v60_v51 = vadd.f32 1e-08, %v59_v48 }
  0xfc   :  { %211 = vlog2.f32 %v74_v50 }
  0xfd   :  { %213 = vlog2.f32 %v60_v51 }
  0xfe   :  { %215 = vlog2.f32 %v88_v53 }
 0x100   :  { %v114_v54 = vpop.xlane.xlu1 %113 }
 0x101   :  { %v100_v55 = vpop.xlane.xlu0 %99  ;;  %v115_v59 = vsel %vm48_vm9, %v114_v54, 1.0 }
 0x102   :  { %v101_v56 = vsel %vm48_vm9, %v100_v55, 1.0  ;;  %v212_v58 = vpop.eup %211  ;;  %v116_v61 = vadd.f32 1e-08, %v115_v59 }
 0x103   :  { %v102_v57 = vadd.f32 1e-08, %v101_v56  ;;  %v214_v60 = vpop.eup %213  ;;  %v76_v62 = vmul.f32 0.6931472, %v212_v58 }
 0x104   :  { %v62_v63 = vmul.f32 0.6931472, %v214_v60  ;;  %v216_v4 = vpop.eup %215 }
 0x105   :  { %217 = vlog2.f32 %v102_v57  ;;  %v90_v9 = vmul.f32 0.6931472, %v216_v4 }
 0x106   :  { %219 = vlog2.f32 %v116_v61  ;;  %v77_v7 = vadd.f32 %v76_v62, %v62_v63 }
 0x108   :  { %v142_v0 = vpop.xlane.xlu1 %141  ;;  %v91_v12 = vadd.f32 %v90_v9, %v77_v7 }
 0x109   :  { %v128_v1 = vpop.xlane.xlu0 %127  ;;  %v143_v2 = vsel %vm48_vm9, %v142_v0, 1.0 }
 0x10a   :  { %v129_v3 = vsel %vm48_vm9, %v128_v1, 1.0  ;;  %v144_v8 = vadd.f32 1e-08, %v143_v2 }
 0x10b   :  { %v130_v5 = vadd.f32 1e-08, %v129_v3  ;;  %v218_v6 = vpop.eup %217 }
 0x10c   :  { %v104_v11 = vmul.f32 0.6931472, %v218_v6  ;;  %v220_v13 = vpop.eup %219 }
 0x10d   :  { %221 = vlog2.f32 %v130_v5  ;;  %v118_v19 = vmul.f32 0.6931472, %v220_v13 }
 0x10e   :  { %223 = vlog2.f32 %v144_v8  ;;  %v105_v15 = vadd.f32 %v104_v11, %v91_v12 }
 0x110   :  { %v119_v21 = vadd.f32 %v118_v19, %v105_v15 }
 0x111   :  { %v156_v14 = vpop.xlane.xlu0 %155 }
 0x112   :  { %v157_v16 = vsel %vm48_vm9, %v156_v14, 1.0 }
 0x113   :  { %v158_v17 = vadd.f32 1e-08, %v157_v16  ;;  %v222_v18 = vpop.eup %221 }
 0x114   :  { %v132_v20 = vmul.f32 0.6931472, %v222_v18  ;;  %v224_v22 = vpop.eup %223 }
 0x115   :  { %225 = vlog2.f32 %v158_v17  ;;  %v146_v24 = vmul.f32 0.6931472, %v224_v22 }
 0x116   :  { %v133_v23 = vadd.f32 %v132_v20, %v119_v21 }
 0x118   :  { %v147_v27 = vadd.f32 %v146_v24, %v133_v23 }
 0x11b   :  { %v226_v25 = vpop.eup %225 }
 0x11c   :  { %v160_v26 = vmul.f32 0.6931472, %v226_v25 }
 0x11e   :  { %v161_v28 = vadd.f32 %v160_v26, %v147_v27 }
 0x120   :  { %v162_v29 = vsel %vm48_vm9, %v161_v28, 0.0 }
 0x121   :  { %189 = vpush %v162_v29 }
 0x152   :  { %s190_s22 = spop %189 }
 0x153   :  { %v168_v30 = vstv %s190_s22 }
 0x154   :  { %v169_v31 = vsel %vm167_vm12, %v168_v30, 0.0 }
 0x155   :  { %170 = vst [vmem:[#allocation7] sm:$0xff] %v169_v31 }
 0x156   :  { %181 = dma.vmem_to_hbm [thread:$0]  %s177_s1, 128, %s179_s21, [#allocation4]  }
 0x157   :  { %303 = dma.done.wait [#allocation4], 128  }
 0x158   :  { %304 = vsyncadd [#allocation4], 4294967168 }
 0x159   :  { %186 = vsyncpa [#allocation3], 1 }
 0x15a   :  { %187 = vsyncpa [#allocation6], 1 }
 0x15b   :  { %188 = vsyncpa [#allocation4], 1 }

</bundles_post_ra>
